<compile_context>
chip_gen: v7x
topology: tpu7x:2x2x1
jax: 0.10.0
libtpu: 0.0.40
codegen_flags: <defaults>
</compile_context>

<pallas_src>
import functools

import jax
import jax.numpy as jnp
import numpy as np
from jax import lax
from jax.experimental import pallas as pl
from jax.experimental.pallas import tpu as pltpu


def resblock_kernel(*refs, proj):
    if proj:
        (x_ref, w1_ref, s1_ref, b1_ref, w2_ref, s2_ref, b2_ref,
         ws_ref, ss_ref, bs_ref, out_ref) = refs
    else:
        (x_ref, w1_ref, s1_ref, b1_ref, w2_ref, s2_ref, b2_ref,
         out_ref) = refs

    H, WCout = out_ref.shape
    cdt = w1_ref.dtype                       # matmul operand dtype (bf16)

    xs = x_ref[...]                          # (H+2, W*Cin), H zero-padded

    # ---- conv1: 3 dy-banded matmuls; N = W*Cout lane-dense -----------------
    acc1 = jnp.dot(xs[0:H, :], w1_ref[0], preferred_element_type=jnp.float32)
    acc1 += jnp.dot(xs[1:H + 1, :], w1_ref[1], preferred_element_type=jnp.float32)
    acc1 += jnp.dot(xs[2:H + 2, :], w1_ref[2], preferred_element_type=jnp.float32)
    h1 = jnp.maximum(acc1 * s1_ref[...] + b1_ref[...], 0.0)   # BN1 + ReLU, f32
    # Dropout2d is identity in eval mode.
    # TODO(synk): training-mode Dropout2d (per-channel Bernoulli via
    # pltpu.prng_*) not implemented.

    # ---- conv2: same banded form; H padding = 2 zero rows -------------------
    zr = jnp.zeros((1, WCout), cdt)
    h1p = jnp.concatenate([zr, h1.astype(cdt), zr], axis=0)   # (H+2, W*Cout)
    acc2 = jnp.dot(h1p[0:H, :], w2_ref[0], preferred_element_type=jnp.float32)
    acc2 += jnp.dot(h1p[1:H + 1, :], w2_ref[1], preferred_element_type=jnp.float32)
    acc2 += jnp.dot(h1p[2:H + 2, :], w2_ref[2], preferred_element_type=jnp.float32)
    res = acc2 * s2_ref[...] + b2_ref[...]                     # BN2, f32

    # ---- shortcut ------------------------------------------------------------
    mid = xs[1:H + 1, :]                                       # original rows
    if proj:        # 1x1 conv as block-diagonal banded matmul + BN
        sc = jnp.dot(mid, ws_ref[...], preferred_element_type=jnp.float32)
        sc = sc * ss_ref[...] + bs_ref[...]
    else:           # identity: (H, W*Cin) layout == (H, W*Cout) since Cin==Cout
        sc = mid.astype(jnp.float32)

    # lane-dense store: last dim = W*Cout (128 at the test shapes).
    out_ref[...] = jnp.maximum(res + sc, 0.0)


def _banded_conv_weight(w_hwio, W, dtype):
    """(3,3,Cin,Cout) HWIO -> (3, W*Cin, W*Cout) banded weights (one per dy).

    band[dy, wi*Cin+ci, wo*Cout+co] = w[dy, wi-wo+1, ci, co] when 0<=wi-wo+1<3,
    else 0 -- which also implements the SAME zero padding along W.
    """
    kh, kw, cin, cout = w_hwio.shape
    sel = np.zeros((kw, W, W), np.float32)          # sel[dx, wi, wo]
    for dx in range(kw):
        for wo in range(W):
            wi = wo + dx - 1
            if 0 <= wi < W:
                sel[dx, wi, wo] = 1.0
    band = jnp.einsum('xio,yxce->yicoe', sel, w_hwio.astype(jnp.float32))
    return band.reshape(kh, W * cin, W * cout).astype(dtype)


def _blockdiag_1x1_weight(ws, W, dtype):
    """(Cin,Cout) 1x1-conv weight -> (W*Cin, W*Cout) block-diagonal weight."""
    cin, cout = ws.shape
    eye = np.eye(W, dtype=np.float32)
    b = jnp.einsum('io,ce->icoe', eye, ws.astype(jnp.float32))
    return b.reshape(W * cin, W * cout).astype(dtype)


def _tile_vec(v, W):
    """(1, C) folded-BN vector -> (1, W*C) matching the (w*C + c) lane layout."""
    return jnp.tile(v.reshape(1, -1), (1, W)).astype(jnp.float32)


def resblock_forward(x_nchw, params, *, compute_dtype=jnp.bfloat16):
    x = jnp.transpose(x_nchw, (0, 2, 3, 1))          # NCHW -> NHWC (C on lanes)
    N, H, W, Cin = x.shape
    Cout = params["w1"].shape[-1]

    # lane-dense (h, w*c) layout; pre-pad H by one zero row each side so the
    # kernel's dy taps are plain sublane slices.
    x = x.astype(compute_dtype).reshape(N, H, W * Cin)
    xp = jnp.pad(x, ((0, 0), (1, 1), (0, 0)))        # (N, H+2, W*Cin)

    w1b = _banded_conv_weight(params["w1"], W, compute_dtype)   # (3, W*Cin, W*Cout)
    w2b = _banded_conv_weight(params["w2"], W, compute_dtype)   # (3, W*Cout, W*Cout)
    s1t, b1t = _tile_vec(params["s1"], W), _tile_vec(params["b1"], W)
    s2t, b2t = _tile_vec(params["s2"], W), _tile_vec(params["b2"], W)

    has_proj = "ws" in params
    const2 = lambda n: (0, 0)
    const3 = lambda n: (0, 0, 0)
    vecspec = pl.BlockSpec((1, W * Cout), const2)

    inputs = [xp, w1b, s1t, b1t, w2b, s2t, b2t]
    in_specs = [
        pl.BlockSpec((None, H + 2, W * Cin), lambda n: (n, 0, 0)),
        pl.BlockSpec((3, W * Cin, W * Cout), const3), vecspec, vecspec,
        pl.BlockSpec((3, W * Cout, W * Cout), const3), vecspec, vecspec,
    ]
    if has_proj:
        wsb = _blockdiag_1x1_weight(params["ws"], W, compute_dtype)
        inputs += [wsb, _tile_vec(params["ss"], W), _tile_vec(params["bs"], W)]
        in_specs += [pl.BlockSpec((W * Cin, W * Cout), const2), vecspec, vecspec]

    out = pl.pallas_call(
        functools.partial(resblock_kernel, proj=has_proj),
        out_shape=jax.ShapeDtypeStruct((N, H, W * Cout), jnp.float32),
        grid=(N,),
        in_specs=in_specs,
        out_specs=pl.BlockSpec((None, H, W * Cout), lambda n: (n, 0, 0)),
        compiler_params=pltpu.CompilerParams(
            dimension_semantics=("parallel",)),
    )(*inputs)
    out = out.reshape(N, H, W, Cout)
    return jnp.transpose(out, (0, 3, 1, 2))          # back to NCHW


def make_params(key, cin, cout, eps=1e-5):
    ks = jax.random.split(key, 12)

    def bn_fold(kg, kb, km, kv):
        gamma = 1.0 + 0.1 * jax.random.normal(kg, (cout,), jnp.float32)
        beta = 0.1 * jax.random.normal(kb, (cout,), jnp.float32)
        mean = 0.05 * jax.random.normal(km, (cout,), jnp.float32)
        var = jax.random.uniform(kv, (cout,), jnp.float32, 0.5, 1.5)
        scale = gamma / jnp.sqrt(var + eps)
        bias = beta - mean * scale
        return scale.reshape(1, cout), bias.reshape(1, cout)

    w1 = 0.1 * jax.random.normal(ks[0], (3, 3, cin, cout), jnp.float32)
    w2 = 0.1 * jax.random.normal(ks[1], (3, 3, cout, cout), jnp.float32)
    s1, b1 = bn_fold(ks[3], ks[4], ks[5], ks[6])
    s2, b2 = bn_fold(ks[7], ks[8], ks[9], ks[10])
    p = dict(w1=w1, s1=s1, b1=b1, w2=w2, s2=s2, b2=b2)
    if cin != cout:                                  # projection shortcut
        p["ws"] = 0.1 * jax.random.normal(ks[2], (cin, cout), jnp.float32)
        p["ss"], p["bs"] = bn_fold(*jax.random.split(ks[11], 4))
    return p


def reference_forward(x_nchw, p, compute_dtype=jnp.bfloat16):
    # Pure-JAX reference (lax.conv) with the same bf16-operand / f32-acc recipe.
    x = jnp.transpose(x_nchw, (0, 2, 3, 1)).astype(compute_dtype)
    cin, cout = p["w1"].shape[2], p["w1"].shape[3]
    dn = ("NHWC", "HWIO", "NHWC")
    w1 = p["w1"].astype(compute_dtype)
    y = lax.conv_general_dilated(
        x, w1, (1, 1), "SAME",
        dimension_numbers=lax.conv_dimension_numbers(x.shape, w1.shape, dn),
        preferred_element_type=jnp.float32)
    y = jnp.maximum(y * p["s1"] + p["b1"], 0.0)
    w2 = p["w2"].astype(compute_dtype)
    y = lax.conv_general_dilated(
        y.astype(compute_dtype), w2, (1, 1), "SAME",
        dimension_numbers=lax.conv_dimension_numbers(y.shape, w2.shape, dn),
        preferred_element_type=jnp.float32)
    y = y * p["s2"] + p["b2"]
    if "ws" in p:
        ws4 = p["ws"].reshape(1, 1, cin, cout).astype(compute_dtype)
        sc = lax.conv_general_dilated(
            x, ws4, (1, 1), "SAME",
            dimension_numbers=lax.conv_dimension_numbers(x.shape, ws4.shape, dn),
            preferred_element_type=jnp.float32)
        sc = sc * p["ss"] + p["bs"]
    else:
        sc = x.astype(jnp.float32)
    out = jnp.maximum(y + sc, 0.0)
    return jnp.transpose(out, (0, 3, 1, 2))


if __name__ == "__main__":
    key = jax.random.PRNGKey(0)
    kx, kp, kx2, kp2 = jax.random.split(key, 4)
    fwd = jax.jit(resblock_forward)

    # Case 1: projection shortcut (Cin != Cout), i.e. ResBlock(4, 8)
    N, Cin, Cout, H, W = 2, 4, 8, 16, 16
    x = jax.random.normal(kx, (N, Cin, H, W), jnp.float32)   # NCHW like PyTorch
    params = make_params(kp, Cin, Cout)
    out = jax.block_until_ready(fwd(x, params))
    ref = reference_forward(x, params)
    np.testing.assert_allclose(np.asarray(out), np.asarray(ref),
                               rtol=1e-2, atol=1e-2)
    assert out.shape == (N, Cout, H, W)

    # Case 2: identity shortcut (Cin == Cout, stride=1), i.e. ResBlock(8, 8)
    Cin2 = Cout2 = 8
    x2 = jax.random.normal(kx2, (N, Cin2, H, W), jnp.float32)
    params2 = make_params(kp2, Cin2, Cout2)
    out2 = jax.block_until_ready(fwd(x2, params2))
    ref2 = reference_forward(x2, params2)
    np.testing.assert_allclose(np.asarray(out2), np.asarray(ref2),
                               rtol=1e-2, atol=1e-2)
    assert out2.shape == (N, Cout2, H, W)

    print("KERNEL_OK")
</pallas_src>

<mosaic_0001>
module attributes {stable_mosaic.version = 11 : i64} {
  func.func @resblock_kernel(%arg0: i32, %arg1: memref<1x18x64xbf16, #tpu.memory_space<vmem>>, %arg2: memref<3x64x128xbf16, #tpu.memory_space<vmem>>, %arg3: memref<1x128xf32, #tpu.memory_space<vmem>>, %arg4: memref<1x128xf32, #tpu.memory_space<vmem>>, %arg5: memref<3x128x128xbf16, #tpu.memory_space<vmem>>, %arg6: memref<1x128xf32, #tpu.memory_space<vmem>>, %arg7: memref<1x128xf32, #tpu.memory_space<vmem>>, %arg8: memref<64x128xbf16, #tpu.memory_space<vmem>>, %arg9: memref<1x128xf32, #tpu.memory_space<vmem>>, %arg10: memref<1x128xf32, #tpu.memory_space<vmem>>, %arg11: memref<1x16x128xf32, #tpu.memory_space<vmem>>) attributes {dimension_semantics = [#tpu.dimension_semantics<parallel>], iteration_bounds = array<i64: 2>, scalar_prefetch = 0 : i64, scratch_operands = 0 : i64, tpu.core_type = #tpu.core_type<tc>, window_params = [{transform_indices = @transform_0, window_bounds = array<i64: 1, 18, 64>}, {pipeline_mode = #tpu.pipeline_mode<synchronous>, transform_indices = @transform_1, window_bounds = array<i64: 3, 64, 128>}, {pipeline_mode = #tpu.pipeline_mode<synchronous>, transform_indices = @transform_2, window_bounds = array<i64: 1, 128>}, {pipeline_mode = #tpu.pipeline_mode<synchronous>, transform_indices = @transform_3, window_bounds = array<i64: 1, 128>}, {pipeline_mode = #tpu.pipeline_mode<synchronous>, transform_indices = @transform_4, window_bounds = array<i64: 3, 128, 128>}, {pipeline_mode = #tpu.pipeline_mode<synchronous>, transform_indices = @transform_5, window_bounds = array<i64: 1, 128>}, {pipeline_mode = #tpu.pipeline_mode<synchronous>, transform_indices = @transform_6, window_bounds = array<i64: 1, 128>}, {pipeline_mode = #tpu.pipeline_mode<synchronous>, transform_indices = @transform_7, window_bounds = array<i64: 64, 128>}, {pipeline_mode = #tpu.pipeline_mode<synchronous>, transform_indices = @transform_8, window_bounds = array<i64: 1, 128>}, {pipeline_mode = #tpu.pipeline_mode<synchronous>, transform_indices = @transform_9, window_bounds = array<i64: 1, 128>}, {transform_indices = @transform_10, window_bounds = array<i64: 1, 16, 128>}]} {
    %c0 = arith.constant 0 : index
    %c0_0 = arith.constant 0 : index
    %c0_1 = arith.constant 0 : index
    %0 = vector.load %arg1[%c0, %c0_0, %c0_1] : memref<1x18x64xbf16, #tpu.memory_space<vmem>>, vector<1x18x64xbf16>
    %1 = vector.shape_cast %0 : vector<1x18x64xbf16> to vector<18x64xbf16>
    %2 = vector.extract_strided_slice %1 {offsets = [0, 0], sizes = [16, 64], strides = [1, 1]} : vector<18x64xbf16> to vector<16x64xbf16>
    %c0_2 = arith.constant 0 : index
    %c0_3 = arith.constant 0 : index
    %c0_4 = arith.constant 0 : index
    %3 = vector.load %arg2[%c0_2, %c0_3, %c0_4] : memref<3x64x128xbf16, #tpu.memory_space<vmem>>, vector<1x64x128xbf16>
    %4 = vector.shape_cast %3 : vector<1x64x128xbf16> to vector<64x128xbf16>
    %cst = arith.constant dense<0.000000e+00> : vector<16x128xf32>
    %5 = tpu.matmul %2, %4, %cst {dimension_numbers = #tpu.dot_dimension_numbers<[1], [0], [0], [1], [0, 0, 1, 1], [], []>} : vector<16x64xbf16>, vector<64x128xbf16>, vector<16x128xf32> -> vector<16x128xf32>
    %6 = vector.extract_strided_slice %1 {offsets = [1, 0], sizes = [16, 64], strides = [1, 1]} : vector<18x64xbf16> to vector<16x64xbf16>
    %c1 = arith.constant 1 : index
    %c0_5 = arith.constant 0 : index
    %c0_6 = arith.constant 0 : index
    %7 = vector.load %arg2[%c1, %c0_5, %c0_6] : memref<3x64x128xbf16, #tpu.memory_space<vmem>>, vector<1x64x128xbf16>
    %8 = vector.shape_cast %7 : vector<1x64x128xbf16> to vector<64x128xbf16>
    %cst_7 = arith.constant dense<0.000000e+00> : vector<16x128xf32>
    %9 = tpu.matmul %6, %8, %cst_7 {dimension_numbers = #tpu.dot_dimension_numbers<[1], [0], [0], [1], [0, 0, 1, 1], [], []>} : vector<16x64xbf16>, vector<64x128xbf16>, vector<16x128xf32> -> vector<16x128xf32>
    %10 = arith.addf %5, %9 : vector<16x128xf32>
    %11 = vector.extract_strided_slice %1 {offsets = [2, 0], sizes = [16, 64], strides = [1, 1]} : vector<18x64xbf16> to vector<16x64xbf16>
    %c2 = arith.constant 2 : index
    %c0_8 = arith.constant 0 : index
    %c0_9 = arith.constant 0 : index
    %12 = vector.load %arg2[%c2, %c0_8, %c0_9] : memref<3x64x128xbf16, #tpu.memory_space<vmem>>, vector<1x64x128xbf16>
    %13 = vector.shape_cast %12 : vector<1x64x128xbf16> to vector<64x128xbf16>
    %cst_10 = arith.constant dense<0.000000e+00> : vector<16x128xf32>
    %14 = tpu.matmul %11, %13, %cst_10 {dimension_numbers = #tpu.dot_dimension_numbers<[1], [0], [0], [1], [0, 0, 1, 1], [], []>} : vector<16x64xbf16>, vector<64x128xbf16>, vector<16x128xf32> -> vector<16x128xf32>
    %15 = arith.addf %10, %14 : vector<16x128xf32>
    %c0_11 = arith.constant 0 : index
    %c0_12 = arith.constant 0 : index
    %16 = vector.load %arg3[%c0_11, %c0_12] : memref<1x128xf32, #tpu.memory_space<vmem>>, vector<1x128xf32>
    %17 = vector.broadcast %16 : vector<1x128xf32> to vector<16x128xf32>
    %18 = arith.mulf %15, %17 : vector<16x128xf32>
    %c0_13 = arith.constant 0 : index
    %c0_14 = arith.constant 0 : index
    %19 = vector.load %arg4[%c0_13, %c0_14] : memref<1x128xf32, #tpu.memory_space<vmem>>, vector<1x128xf32>
    %20 = vector.broadcast %19 : vector<1x128xf32> to vector<16x128xf32>
    %21 = arith.addf %18, %20 : vector<16x128xf32>
    %cst_15 = arith.constant 0.000000e+00 : f32
    %22 = vector.broadcast %cst_15 : f32 to vector<16x128xf32>
    %23 = arith.maximumf %21, %22 : vector<16x128xf32>
    %cst_16 = arith.constant 0.000000e+00 : bf16
    %24 = vector.broadcast %cst_16 : bf16 to vector<1x128xbf16>
    %25 = arith.truncf %23 : vector<16x128xf32> to vector<16x128xbf16>
    %26 = tpu.concatenate %24, %25, %24 in 0 : vector<1x128xbf16>, vector<16x128xbf16>, vector<1x128xbf16> -> vector<18x128xbf16>
    %27 = vector.extract_strided_slice %26 {offsets = [0, 0], sizes = [16, 128], strides = [1, 1]} : vector<18x128xbf16> to vector<16x128xbf16>
    %c0_17 = arith.constant 0 : index
    %c0_18 = arith.constant 0 : index
    %c0_19 = arith.constant 0 : index
    %28 = vector.load %arg5[%c0_17, %c0_18, %c0_19] : memref<3x128x128xbf16, #tpu.memory_space<vmem>>, vector<1x128x128xbf16>
    %29 = vector.shape_cast %28 : vector<1x128x128xbf16> to vector<128x128xbf16>
    %cst_20 = arith.constant dense<0.000000e+00> : vector<16x128xf32>
    %30 = tpu.matmul %27, %29, %cst_20 {dimension_numbers = #tpu.dot_dimension_numbers<[1], [0], [0], [1], [0, 0, 1, 1], [], []>} : vector<16x128xbf16>, vector<128x128xbf16>, vector<16x128xf32> -> vector<16x128xf32>
    %31 = vector.extract_strided_slice %26 {offsets = [1, 0], sizes = [16, 128], strides = [1, 1]} : vector<18x128xbf16> to vector<16x128xbf16>
    %c1_21 = arith.constant 1 : index
    %c0_22 = arith.constant 0 : index
    %c0_23 = arith.constant 0 : index
    %32 = vector.load %arg5[%c1_21, %c0_22, %c0_23] : memref<3x128x128xbf16, #tpu.memory_space<vmem>>, vector<1x128x128xbf16>
    %33 = vector.shape_cast %32 : vector<1x128x128xbf16> to vector<128x128xbf16>
    %cst_24 = arith.constant dense<0.000000e+00> : vector<16x128xf32>
    %34 = tpu.matmul %31, %33, %cst_24 {dimension_numbers = #tpu.dot_dimension_numbers<[1], [0], [0], [1], [0, 0, 1, 1], [], []>} : vector<16x128xbf16>, vector<128x128xbf16>, vector<16x128xf32> -> vector<16x128xf32>
    %35 = arith.addf %30, %34 : vector<16x128xf32>
    %36 = vector.extract_strided_slice %26 {offsets = [2, 0], sizes = [16, 128], strides = [1, 1]} : vector<18x128xbf16> to vector<16x128xbf16>
    %c2_25 = arith.constant 2 : index
    %c0_26 = arith.constant 0 : index
    %c0_27 = arith.constant 0 : index
    %37 = vector.load %arg5[%c2_25, %c0_26, %c0_27] : memref<3x128x128xbf16, #tpu.memory_space<vmem>>, vector<1x128x128xbf16>
    %38 = vector.shape_cast %37 : vector<1x128x128xbf16> to vector<128x128xbf16>
    %cst_28 = arith.constant dense<0.000000e+00> : vector<16x128xf32>
    %39 = tpu.matmul %36, %38, %cst_28 {dimension_numbers = #tpu.dot_dimension_numbers<[1], [0], [0], [1], [0, 0, 1, 1], [], []>} : vector<16x128xbf16>, vector<128x128xbf16>, vector<16x128xf32> -> vector<16x128xf32>
    %40 = arith.addf %35, %39 : vector<16x128xf32>
    %c0_29 = arith.constant 0 : index
    %c0_30 = arith.constant 0 : index
    %41 = vector.load %arg6[%c0_29, %c0_30] : memref<1x128xf32, #tpu.memory_space<vmem>>, vector<1x128xf32>
    %42 = vector.broadcast %41 : vector<1x128xf32> to vector<16x128xf32>
    %43 = arith.mulf %40, %42 : vector<16x128xf32>
    %c0_31 = arith.constant 0 : index
    %c0_32 = arith.constant 0 : index
    %44 = vector.load %arg7[%c0_31, %c0_32] : memref<1x128xf32, #tpu.memory_space<vmem>>, vector<1x128xf32>
    %45 = vector.broadcast %44 : vector<1x128xf32> to vector<16x128xf32>
    %46 = arith.addf %43, %45 : vector<16x128xf32>
    %47 = vector.extract_strided_slice %1 {offsets = [1, 0], sizes = [16, 64], strides = [1, 1]} : vector<18x64xbf16> to vector<16x64xbf16>
    %c0_33 = arith.constant 0 : index
    %c0_34 = arith.constant 0 : index
    %48 = vector.load %arg8[%c0_33, %c0_34] : memref<64x128xbf16, #tpu.memory_space<vmem>>, vector<64x128xbf16>
    %cst_35 = arith.constant dense<0.000000e+00> : vector<16x128xf32>
    %49 = tpu.matmul %47, %48, %cst_35 {dimension_numbers = #tpu.dot_dimension_numbers<[1], [0], [0], [1], [0, 0, 1, 1], [], []>} : vector<16x64xbf16>, vector<64x128xbf16>, vector<16x128xf32> -> vector<16x128xf32>
    %c0_36 = arith.constant 0 : index
    %c0_37 = arith.constant 0 : index
    %50 = vector.load %arg9[%c0_36, %c0_37] : memref<1x128xf32, #tpu.memory_space<vmem>>, vector<1x128xf32>
    %51 = vector.broadcast %50 : vector<1x128xf32> to vector<16x128xf32>
    %52 = arith.mulf %49, %51 : vector<16x128xf32>
    %c0_38 = arith.constant 0 : index
    %c0_39 = arith.constant 0 : index
    %53 = vector.load %arg10[%c0_38, %c0_39] : memref<1x128xf32, #tpu.memory_space<vmem>>, vector<1x128xf32>
    %54 = vector.broadcast %53 : vector<1x128xf32> to vector<16x128xf32>
    %55 = arith.addf %52, %54 : vector<16x128xf32>
    %56 = arith.addf %46, %55 : vector<16x128xf32>
    %cst_40 = arith.constant 0.000000e+00 : f32
    %57 = vector.broadcast %cst_40 : f32 to vector<16x128xf32>
    %58 = arith.maximumf %56, %57 : vector<16x128xf32>
    %c0_41 = arith.constant 0 : index
    %c0_42 = arith.constant 0 : index
    %c0_43 = arith.constant 0 : index
    %59 = vector.load %arg11[%c0_41, %c0_42, %c0_43] : memref<1x16x128xf32, #tpu.memory_space<vmem>>, vector<1x16x128xf32>
    %60 = vector.shape_cast %59 : vector<1x16x128xf32> to vector<16x128xf32>
    %61 = vector.shape_cast %58 : vector<16x128xf32> to vector<1x16x128xf32>
    tpu.vector_store %arg11[%c0_41, %c0_42, %c0_43], %61 {strides = array<i32>} : memref<1x16x128xf32, #tpu.memory_space<vmem>>, vector<1x16x128xf32>,
    return
  }
  func.func @transform_0(%arg0: i32) -> (i32, i32, i32) {
    %c0_i32 = arith.constant 0 : i32
    %c0_i32_0 = arith.constant 0 : i32
    %c0_i32_1 = arith.constant 0 : i32
    return %arg0, %c0_i32, %c0_i32_0 : i32, i32, i32
  }
  func.func @transform_1(%arg0: i32) -> (i32, i32, i32) {
    %c0_i32 = arith.constant 0 : i32
    %c0_i32_0 = arith.constant 0 : i32
    %c0_i32_1 = arith.constant 0 : i32
    %c0_i32_2 = arith.constant 0 : i32
    return %c0_i32, %c0_i32_0, %c0_i32_1 : i32, i32, i32
  }
  func.func @transform_2(%arg0: i32) -> (i32, i32) {
    %c0_i32 = arith.constant 0 : i32
    %c0_i32_0 = arith.constant 0 : i32
    %c0_i32_1 = arith.constant 0 : i32
    return %c0_i32, %c0_i32_0 : i32, i32
  }
  func.func @transform_3(%arg0: i32) -> (i32, i32) {
    %c0_i32 = arith.constant 0 : i32
    %c0_i32_0 = arith.constant 0 : i32
    %c0_i32_1 = arith.constant 0 : i32
    return %c0_i32, %c0_i32_0 : i32, i32
  }
  func.func @transform_4(%arg0: i32) -> (i32, i32, i32) {
    %c0_i32 = arith.constant 0 : i32
    %c0_i32_0 = arith.constant 0 : i32
    %c0_i32_1 = arith.constant 0 : i32
    %c0_i32_2 = arith.constant 0 : i32
    return %c0_i32, %c0_i32_0, %c0_i32_1 : i32, i32, i32
  }
  func.func @transform_5(%arg0: i32) -> (i32, i32) {
    %c0_i32 = arith.constant 0 : i32
    %c0_i32_0 = arith.constant 0 : i32
    %c0_i32_1 = arith.constant 0 : i32
    return %c0_i32, %c0_i32_0 : i32, i32
  }
  func.func @transform_6(%arg0: i32) -> (i32, i32) {
    %c0_i32 = arith.constant 0 : i32
    %c0_i32_0 = arith.constant 0 : i32
    %c0_i32_1 = arith.constant 0 : i32
    return %c0_i32, %c0_i32_0 : i32, i32
  }
  func.func @transform_7(%arg0: i32) -> (i32, i32) {
    %c0_i32 = arith.constant 0 : i32
    %c0_i32_0 = arith.constant 0 : i32
    %c0_i32_1 = arith.constant 0 : i32
    return %c0_i32, %c0_i32_0 : i32, i32
  }
  func.func @transform_8(%arg0: i32) -> (i32, i32) {
    %c0_i32 = arith.constant 0 : i32
    %c0_i32_0 = arith.constant 0 : i32
    %c0_i32_1 = arith.constant 0 : i32
    return %c0_i32, %c0_i32_0 : i32, i32
  }
  func.func @transform_9(%arg0: i32) -> (i32, i32) {
    %c0_i32 = arith.constant 0 : i32
    %c0_i32_0 = arith.constant 0 : i32
    %c0_i32_1 = arith.constant 0 : i32
    return %c0_i32, %c0_i32_0 : i32, i32
  }
  func.func @transform_10(%arg0: i32) -> (i32, i32, i32) {
    %c0_i32 = arith.constant 0 : i32
    %c0_i32_0 = arith.constant 0 : i32
    %c0_i32_1 = arith.constant 0 : i32
    return %arg0, %c0_i32, %c0_i32_0 : i32, i32, i32
  }
}

</mosaic_0001>

<bundles_post_ra>
// kernel: resblock_forward.1
= control target key start
LH: loop header
LB: loop body
LE: loop exit
PB: predicated region body
PF: predicated region fallthrough
CT: control target
= control target key end

     0   :  { %s1564_s13 = smov 0   ;;  %s1789_s0 = inlined_call_operand.vmem [shape: bf16[2,18,64], index: 0, kind: input, shape index: {}]   ;;  %s1790_s1 = inlined_call_operand.vmem [shape: bf16[3,64,128], index: 1, kind: input, shape index: {}]   ;;  %s1791_s2 = inlined_call_operand.vmem [shape: f32[1,128], index: 2, kind: input, shape index: {}]   ;;  %s1792_s3 = inlined_call_operand.vmem [shape: f32[1,128], index: 3, kind: input, shape index: {}]   ;;  %s1793_s4 = inlined_call_operand.vmem [shape: bf16[3,128,128], index: 4, kind: input, shape index: {}]   ;;  %s1794_s5 = inlined_call_operand.vmem [shape: f32[1,128], index: 5, kind: input, shape index: {}]   ;;  %s1795_s6 = inlined_call_operand.vmem [shape: f32[1,128], index: 6, kind: input, shape index: {}]   ;;  %s1796_s7 = inlined_call_operand.vmem [shape: bf16[64,128], index: 7, kind: input, shape index: {}]   ;;  %s1797_s8 = inlined_call_operand.vmem [shape: f32[1,128], index: 8, kind: input, shape index: {}]   ;;  %s1798_s9 = inlined_call_operand.vmem [shape: f32[1,128], index: 9, kind: input, shape index: {}]   ;;  %s1799_s10 = inlined_call_operand.vmem [shape: f32[2,16,128], index: 10, kind: output, shape index: {}]  }
   0x1 LB: > { %s1164_s14 = sadd.s32 4294967295, %s1505_s13   ;;  %p1168_p0 = scmp.ge.s32.totalorder %s1505_s13, 1  ;;  %s1505_s13 = sphi %s1564_s13, %s20_s13  }
   0x2   : > { %p312_p1 = scmp.lt.s32.totalorder %s1505_s13, 3 }
   0x4   : > { %p313_p2 = pnand %p1168_p0, %p312_p1 }
   0x5   : > { %v1457_v0 = vld [vmem:[%s1790_s1 + $0x20] sm:$0xff] (!%p313_p2)   ;;  %v1507_v1 = vmov (!%p313_p2), 0.0   ;;  %v1458_v2 = vld [vmem:[%s1790_s1 + $0x28] sm:$0xff] (!%p313_p2)   ;;  %vm1508_vm0 = vmmov (!%p313_p2), 0   ;;  %p350_p3 = scmp.lt.s32.totalorder (!%p313_p2), %s1164_s14, 1  ;;  %v1459_v3 = vld [vmem:[%s1790_s1 + $0x30] sm:$0xff] (!%p313_p2)  }
   0x6   : > { %316 = sbr.rel (%p313_p2) target bundleno = 580 (0x244), region = 60  ;;  %1322 = vmatprep.subr.bf16.mxu0 (!%p313_p2), %v1507_v1  ;;  %1358 = vmatprep.subr.bf16.mxu1 (!%p313_p2), %v1507_v1  ;;  %v1460_v4 = vld [vmem:[%s1790_s1 + $0x38] sm:$0xff] (!%p313_p2)   ;;  %vm389_vm1 = vsmask.f32 (!%p313_p2), 7424  ;;  %v1463_v12 = vld [vmem:[%s1790_s1] sm:$0xff] (!%p313_p2)   ;;  %vm426_vm2 = vcmask (!%p313_p2), 523264  }
   0x7   : > { %1323 = vmatpush3.bf16.msra.mxu0 (!%p313_p2), %v1457_v0  ;;  %1330 = vmatprep.mubr.msk.bf16.mxu0 (!%p313_p2), %vm1508_vm0, %v1507_v1  ;;  %v1471_v13 = vld [vmem:[%s1793_s4 + $0x40] sm:$0xff] (!%p313_p2)   ;;  %v1472_v15 = vld [vmem:[%s1793_s4 + $0x48] sm:$0xff] (!%p313_p2)   ;;  %v1465_v18 = vld [vmem:[%s1790_s1 + $0x10] sm:$0xff] (!%p313_p2)   ;;  %vm547_vm3 = vcmask (!%p313_p2), 1046528   ;;  %vm651_vm4 = vcmask (!%p313_p2), 1040384  }
   0x8   : > { %1324 = vmatprep.subr.bf16.mxu0 (!%p313_p2), %v1507_v1  ;;  %1374 = vmatprep.mubr.msk.bf16.mxu1 (!%p313_p2), %vm1508_vm0, %v1507_v1  ;;  %v1464_v17 = vld [vmem:[%s1790_s1 + $0x8] sm:$0xff] (!%p313_p2)   ;;  %v1466_v19 = vld [vmem:[%s1790_s1 + $0x18] sm:$0xff] (!%p313_p2)   ;;  %v1467_v20 = vld [vmem:[%s1790_s1 + $0x40] sm:$0xff] (!%p313_p2)   ;;  %vm652_vm5 = vsmask.f32 (!%p313_p2), 256 }
   0x9   : > { %1359 = vmatpush3.bf16.msra.mxu1 (!%p313_p2), %v1471_v13  ;;  %v1468_v21 = vld [vmem:[%s1790_s1 + $0x48] sm:$0xff] (!%p313_p2)   ;;  %v1469_v22 = vld [vmem:[%s1790_s1 + $0x50] sm:$0xff] (!%p313_p2)   ;;  %v1470_v23 = vld [vmem:[%s1790_s1 + $0x58] sm:$0xff] (!%p313_p2)  }
   0xa   : > { %1360 = vmatprep.subr.bf16.mxu1 (!%p313_p2), %v1507_v1  ;;  %v1473_v27 = vld [vmem:[%s1793_s4 + $0x50] sm:$0xff] (!%p313_p2)   ;;  %v1474_v28 = vld [vmem:[%s1793_s4 + $0x58] sm:$0xff] (!%p313_p2)   ;;  %v1475_v29 = vld [vmem:[%s1793_s4 + $0x60] sm:$0xff] (!%p313_p2)  }
   0xb   : > { %1325 = vmatpush3.bf16.msra.mxu0 (!%p313_p2), %v1458_v2  ;;  %v1476_v30 = vld [vmem:[%s1793_s4 + $0x68] sm:$0xff] (!%p313_p2)   ;;  %v1477_v31 = vld [vmem:[%s1793_s4 + $0x70] sm:$0xff] (!%p313_p2)   ;;  %v1478_v32 = vld [vmem:[%s1793_s4 + $0x78] sm:$0xff] (!%p313_p2)  }
   0xc   : > { %1326 = vmatprep.subr.bf16.mxu0 (!%p313_p2), %v1507_v1  ;;  %v1491_v33 = vld [vmem:[%s1796_s7] sm:$0xff] (!%p313_p2)   ;;  %v1493_v34 = vld [vmem:[%s1796_s7 + $0x8] sm:$0xff] (!%p313_p2)   ;;  %v1495_v35 = vld [vmem:[%s1796_s7 + $0x10] sm:$0xff] (!%p313_p2)  }
   0xd   : > { %s1801_s14 = smov (!%p350_p3, %s1164_s14), 1  ;;  %1361 = vmatpush3.bf16.msra.mxu1 %v1472_v15  ;;  %v1497_v36 = vld [vmem:[%s1796_s7 + $0x18] sm:$0xff]   ;;  %v1205_v37 = vld [vmem:[%s1791_s2] ss:$0 sm:$0xff]  ;;  %vm653_vm6 = vmand %vm651_vm4, %vm652_vm5 }
   0xe   : > { %s1446_s21 = smul.u32 12, %s1801_s14  ;;  %1362 = vmatprep.subr.bf16.mxu1 %v1507_v1  ;;  %v1206_v39 = vld [vmem:[%s1792_s3] ss:$0 sm:$0xff]  ;;  %v1489_v13 = vld [vmem:[%s1793_s4 + $0x90] sm:$0xff]  }
   0xf   : > { %1327 = vmatpush3.bf16.msra.mxu0 %v1459_v3  ;;  %v1479_v2 = vld [vmem:[%s1793_s4] sm:$0xff]  }
  0x10   : > { %s354_s24 = scalar_lea.vmem %s1789_s0, %s1446_s21  ;;  %1328 = vmatprep.subr.bf16.mxu0 %v1507_v1  ;;  %v1492_v15 = vld [vmem:[%s1793_s4 + $0xa0] sm:$0xff]   ;;  %s1274_s21 = sshll.u32 %s1801_s14, 4 }
  0x11   : > { %v1461_v5 = vld [vmem:[%s354_s24] sm:$0xff]   ;;  %v1462_v6 = vld [vmem:[%s354_s24 + $0x8] ss:$0 sps:$4 sm:$0x11]   ;;  %1363 = vmatpush3.bf16.msra.mxu1 %v1473_v27  ;;  %s359_s24 = scalar_lea.vmem %s1799_s10, %s1274_s21 }
  0x12   : > { %v391_v7 = vshrl.u32 %v1461_v5, 16  ;;  %v393_v8 = vshll.u32 %v1461_v5, 16  ;;  %v398_v9 = vshll.u32 %v1462_v6, 16  ;;  %v548_v24 = vrot.slane %v1461_v5, 1  ;;  %1364 = vmatprep.subr.bf16.mxu1 %v1507_v1  ;;  %v1264_v27 = vld [vmem:[%s1795_s6] ss:$0 sm:$0xff] }
  0x13   : > { %1329 = vmatpush3.bf16.msra.mxu0 %v1460_v4  ;;  %v549_v25 = vrot.slane %v1462_v6, 1  ;;  %v1480_v4 = vld [vmem:[%s1793_s4 + $0x8] sm:$0xff]   ;;  %v1482_v6 = vld [vmem:[%s1793_s4 + $0x18] sm:$0xff]  }
  0x14   : > { %v395_v10 = vrot.slane %v393_v8, 1  ;;  %v400_v11 = vrot.slane %v398_v9, 1  ;;  %1334 = vmatprep.subr.bf16.mxu0 %v1507_v1  ;;  %v1484_v8 = vld [vmem:[%s1793_s4 + $0x28] sm:$0xff]   ;;  %v1485_v9 = vld [vmem:[%s1793_s4 + $0x30] sm:$0xff]  }
  0x15   : > { %v550_v26 = vsel %vm547_vm3, %v548_v24, %v549_v25  ;;  %1365 = vmatpush3.bf16.msra.mxu1 %v1474_v28  ;;  %v1271_v25 = vld [vmem:[%s1798_s9] ss:$0 sm:$0xff] }
  0x16   : > { %v396_v14 = vor.u32 %v395_v10, %v391_v7  ;;  %1366 = vmatprep.subr.bf16.mxu1 %v1507_v1  ;;  %v1483_v7 = vld [vmem:[%s1793_s4 + $0x20] sm:$0xff]   ;;  %v1486_v10 = vld [vmem:[%s1793_s4 + $0x38] sm:$0xff]  }
  0x18   : > { %v1611_v16 = vsel %vm389_vm1, %v396_v14, %v400_v11  ;;  %v1487_v11 = vld [vmem:[%s1793_s4 + $0x80] sm:$0xff]   ;;  %v1490_v14 = vld [vmem:[%s1793_s4 + $0x98] sm:$0xff]  }
  0x19   : > { %1331 = vmatmul.mubr.msk.bf16.vlgmr.msra.gmra.mrb[0].mxu0 %vm426_vm2, %v1611_v16  ;;  %1367 = vmatpush3.bf16.msra.mxu1 %v1475_v29 }
  0x1a   : > { %1335 = vmatpush3.bf16.msra.mxu0 %v1463_v12  ;;  %1342 = vmatprep.mubr.msk.bf16.mxu0 %vm1508_vm0, %v1507_v1  ;;  %v1488_v12 = vld [vmem:[%s1793_s4 + $0x88] sm:$0xff]  }
  0x1b   : > { %1336 = vmatprep.subr.bf16.mxu0 %v1507_v1  ;;  %1368 = vmatprep.subr.bf16.mxu1 %v1507_v1 }
  0x1d   : > { %1369 = vmatpush3.bf16.msra.mxu1 %v1476_v30 }
  0x1e   : > { %1337 = vmatpush3.bf16.msra.mxu0 %v1464_v17  ;;  %1370 = vmatprep.subr.bf16.mxu1 %v1507_v1  ;;  %v1496_v17 = vld [vmem:[%s1793_s4 + $0xb0] sm:$0xff]  }
  0x1f   : > { %1338 = vmatprep.subr.bf16.mxu0 %v1507_v1 }
  0x21   : > { %1371 = vmatpush3.bf16.msra.mxu1 %v1477_v31 }
  0x22   : > { %1339 = vmatpush3.bf16.msra.mxu0 %v1465_v18  ;;  %1372 = vmatprep.subr.bf16.mxu1 %v1507_v1  ;;  %v1498_v18 = vld [vmem:[%s1793_s4 + $0xb8] sm:$0xff]  }
  0x23   : > { %1340 = vmatprep.subr.bf16.mxu0 %v1507_v1 }
  0x25   : > { %1373 = vmatpush3.bf16.msra.mxu1 %v1478_v32 }
  0x26   : > { %1341 = vmatpush3.bf16.msra.mxu0 %v1466_v19  ;;  %1378 = vmatprep.subr.bf16.mxu1 %v1507_v1 }
  0x27   : > { %1346 = vmatprep.subr.bf16.mxu0 %v1507_v1 }
  0x29   : > { %1343 = vmatmul.mubr.msk.bf16.vlgmr.msra.gmra.mrb[0].mxu0 %vm426_vm2, %v1461_v5  ;;  %v1481_v5 = vld [vmem:[%s1793_s4 + $0x10] sm:$0xff]  }
  0x2a   : > { %1347 = vmatpush3.bf16.msra.mxu0 %v1467_v20  ;;  %1354 = vmatprep.mubr.msk.bf16.mxu0 %vm1508_vm0, %v1507_v1 }
  0x2b   : > { %1348 = vmatprep.subr.bf16.mxu0 %v1507_v1 }
  0x2e   : > { %1349 = vmatpush3.bf16.msra.mxu0 %v1468_v21 }
  0x2f   : > { %1350 = vmatprep.subr.bf16.mxu0 %v1507_v1 }
  0x32   : > { %1351 = vmatpush3.bf16.msra.mxu0 %v1469_v22 }
  0x33   : > { %1352 = vmatprep.subr.bf16.mxu0 %v1507_v1 }
  0x36   : > { %1353 = vmatpush3.bf16.msra.mxu0 %v1470_v23  ;;  %v1270_v23 = vld [vmem:[%s1797_s8] ss:$0 sm:$0xff] }
  0x37   : > { %1418 = vmatprep.subr.bf16.mxu0 %v1507_v1 }
  0x39   : > { %1355 = vmatmul.mubr.msk.bf16.vlgmr.msra.gmra.mrb[0].mxu0 %vm426_vm2, %v550_v26 }
  0x3a   : > { %1426 = vmatprep.mubr.msk.bf16.mxu0 %vm1508_vm0, %v1507_v1  ;;  %1419 = vmatpush3.bf16.msra.mxu0 %v1491_v33 }
  0x3b   : > { %1420 = vmatprep.subr.bf16.mxu0 %v1507_v1 }
  0x3e   : > { %1421 = vmatpush3.bf16.msra.mxu0 %v1493_v34 }
  0x3f   : > { %1422 = vmatprep.subr.bf16.mxu0 %v1507_v1 }
  0x42   : > { %1423 = vmatpush3.bf16.msra.mxu0 %v1495_v35 }
  0x43   : > { %1424 = vmatprep.subr.bf16.mxu0 %v1507_v1 }
  0x46   : > { %1425 = vmatpush3.bf16.msra.mxu0 %v1497_v36 }
  0x49   : > { %1427 = vmatmul.mubr.msk.bf16.vlgmr.msra.gmra.mrb[4].mxu0 %vm426_vm2, %v1611_v16  ;;  %v1494_v16 = vld [vmem:[%s1793_s4 + $0xa8] sm:$0xff]  }
 0x10c   : > { %v612_v38 = vpop.f32.mrb[0].mxu0 }
 0x10d   : > { %v628_v40 = vmul.f32 %v1205_v37, %v612_v38  ;;  %v1356_v41 = vpop.f32.mrb[1].mxu0 }
 0x10e   : > { %v615_v42 = vpop.f32.mrb[2].mxu0 }
 0x10f   : > { %v637_v43 = vadd.f32 %v1206_v39, %v628_v40  ;;  %v629_v44 = vmul.f32 %v1205_v37, %v615_v42  ;;  %v1357_v45 = vpop.f32.mrb[3].mxu0 }
 0x111   : > { %v638_v46 = vadd.f32 %v1206_v39, %v629_v44  ;;  %v639_v47 = vmax.f32 %v637_v43, 0.0 }
 0x113   : > { %v640_v48 = vmax.f32 %v638_v46, 0.0 }
 0x115   : > { %v641_v49 = vpack.c.bf16 %v640_v48, %v639_v47 }
 0x117   : > { %v643_v50 = vshrl.u32 %v641_v49, 16  ;;  %v646_v52 = vshll.u32 %v641_v49, 16 }
 0x119   : > { %v645_v51 = vrot.slane %v643_v50, 7 }
 0x11b   : > { %v648_v53 = vor.u32 %v646_v52, %v645_v51  ;;  %v655_v54 = vsel %vm653_vm6, %v645_v51, 0 }
 0x11c   : > { %v697_v57 = vshll.u32 %v655_v54, 16  ;;  %v900_v59 = vrot.slane %v655_v54, 1  ;;  %v1078_v19 = vpop.f32.mrb[4].mxu0 }
 0x11d   : > { %v654_v55 = vsel %vm653_vm6, 0, %v648_v53  ;;  %v1428_v20 = vpop.f32.mrb[5].mxu0  ;;  %v1092_v24 = vmul.f32 %v1270_v23, %v1078_v19 }
 0x11e   : > { %v692_v56 = vshll.u32 %v654_v55, 16  ;;  %v899_v58 = vrot.slane %v654_v55, 1  ;;  %v690_v60 = vshrl.u32 %v654_v55, 16  ;;  %v699_v0 = vrot.slane %v697_v57, 1  ;;  %v1081_v21 = vpop.f32.mrb[6].mxu0 }
 0x11f   : > { %v1429_v22 = vpop.f32.mrb[7].mxu0  ;;  %v1101_v28 = vadd.f32 %v1271_v25, %v1092_v24  ;;  %v1093_v29 = vmul.f32 %v1270_v23, %v1081_v21 }
 0x120   : > { %v694_v61 = vrot.slane %v692_v56, 1  ;;  %v901_v62 = vsel %vm547_vm3, %v899_v58, %v900_v59 }
 0x121   : > { %v1102_v36 = vadd.f32 %v1271_v25, %v1093_v29 }
 0x122   : > { %v695_v63 = vor.u32 %v694_v61, %v690_v60 }
 0x124   : > { %v700_v3 = vsel %vm389_vm1, %v695_v63, %v699_v0 }
 0x125   : > { %1375 = vmatmul.mubr.bf16.vlgmr.msra.gmra.mrb[0].mxu1 %v700_v3 }
 0x126   : > { %1379 = vmatpush3.bf16.msra.mxu1 %v1479_v2  ;;  %1394 = vmatprep.mubr.msk.bf16.mxu1 %vm1508_vm0, %v1507_v1 }
 0x127   : > { %1380 = vmatprep.subr.bf16.mxu1 %v1507_v1 }
 0x12a   : > { %1381 = vmatpush3.bf16.msra.mxu1 %v1480_v4 }
 0x12b   : > { %1382 = vmatprep.subr.bf16.mxu1 %v1507_v1 }
 0x12e   : > { %1383 = vmatpush3.bf16.msra.mxu1 %v1481_v5 }
 0x12f   : > { %1384 = vmatprep.subr.bf16.mxu1 %v1507_v1 }
 0x132   : > { %1385 = vmatpush3.bf16.msra.mxu1 %v1482_v6 }
 0x133   : > { %1386 = vmatprep.subr.bf16.mxu1 %v1507_v1 }
 0x136   : > { %1387 = vmatpush3.bf16.msra.mxu1 %v1483_v7 }
 0x137   : > { %1388 = vmatprep.subr.bf16.mxu1 %v1507_v1 }
 0x13a   : > { %1389 = vmatpush3.bf16.msra.mxu1 %v1484_v8 }
 0x13b   : > { %1390 = vmatprep.subr.bf16.mxu1 %v1507_v1 }
 0x13e   : > { %1391 = vmatpush3.bf16.msra.mxu1 %v1485_v9 }
 0x13f   : > { %1392 = vmatprep.subr.bf16.mxu1 %v1507_v1 }
 0x142   : > { %1393 = vmatpush3.bf16.msra.mxu1 %v1486_v10 }
 0x143   : > { %1398 = vmatprep.subr.bf16.mxu1 %v1507_v1 }
 0x145   : > { %1395 = vmatmul.mubr.bf16.vlgmr.msra.gmra.mrb[0].mxu1 %v654_v55 }
 0x146   : > { %1399 = vmatpush3.bf16.msra.mxu1 %v1487_v11  ;;  %1414 = vmatprep.mubr.msk.bf16.mxu1 %vm1508_vm0, %v1507_v1 }
 0x147   : > { %1400 = vmatprep.subr.bf16.mxu1 %v1507_v1 }
 0x14a   : > { %1401 = vmatpush3.bf16.msra.mxu1 %v1488_v12 }
 0x14b   : > { %1402 = vmatprep.subr.bf16.mxu1 %v1507_v1 }
 0x14e   : > { %1403 = vmatpush3.bf16.msra.mxu1 %v1489_v13 }
 0x14f   : > { %1404 = vmatprep.subr.bf16.mxu1 %v1507_v1 }
 0x152   : > { %1405 = vmatpush3.bf16.msra.mxu1 %v1490_v14 }
 0x153   : > { %1406 = vmatprep.subr.bf16.mxu1 %v1507_v1 }
 0x156   : > { %1407 = vmatpush3.bf16.msra.mxu1 %v1492_v15 }
 0x157   : > { %1408 = vmatprep.subr.bf16.mxu1 %v1507_v1 }
 0x15a   : > { %1409 = vmatpush3.bf16.msra.mxu1 %v1494_v16 }
 0x15b   : > { %1410 = vmatprep.subr.bf16.mxu1 %v1507_v1 }
 0x15e   : > { %1411 = vmatpush3.bf16.msra.mxu1 %v1496_v17 }
 0x15f   : > { %1412 = vmatprep.subr.bf16.mxu1 %v1507_v1  ;;  %v1263_v1 = vld [vmem:[%s1794_s5] ss:$0 sm:$0xff] }
 0x162   : > { %1413 = vmatpush3.bf16.msra.mxu1 %v1498_v18 }
 0x165   : > { %1415 = vmatmul.mubr.bf16.vlgmr.msra.gmra.mrb[0].mxu1 %v901_v62 }
 0x238   : > { %v985_v26 = vpop.f32.mrb[0].mxu1 }
 0x239   : > { %v1001_v30 = vmul.f32 %v1263_v1, %v985_v26  ;;  %v1416_v31 = vpop.f32.mrb[1].mxu1 }
 0x23a   : > { %v988_v32 = vpop.f32.mrb[2].mxu1 }
 0x23b   : > { %v1010_v33 = vadd.f32 %v1264_v27, %v1001_v30  ;;  %v1002_v34 = vmul.f32 %v1263_v1, %v988_v32  ;;  %v1417_v35 = vpop.f32.mrb[3].mxu1 }
 0x23d   : > { %v1103_v37 = vadd.f32 %v1101_v28, %v1010_v33  ;;  %v1011_v38 = vadd.f32 %v1264_v27, %v1002_v34 }
 0x23f   : > { %v1105_v39 = vmax.f32 %v1103_v37, 0.0  ;;  %v1104_v40 = vadd.f32 %v1102_v36, %v1011_v38 }
 0x241   : > { %1107 = vst [vmem:[%s359_s24] sm:$0xff] %v1105_v39  ;;  %v1106_v41 = vmax.f32 %v1104_v40, 0.0 }
 0x243   : > { %1108 = vst [vmem:[%s359_s24 + $0x8] sm:$0xff] %v1106_v41 }
 0x244 PF: > { %s20_s13 = sadd.s32 1, %s1505_s13  }
 0x245   : > { %p17_p4 = scmp.ge.s32.totalorder %s20_s13, 4  }
 0x247   :  { %19 = sbr.rel (!%p17_p4) target bundleno = 1 (0x1), region = 94 }

</bundles_post_ra>
